<compile_context>
chip_gen: v7x
topology: tpu7x:2x2x1
jax: 0.10.0
libtpu: 0.0.40
codegen_flags: <defaults>
</compile_context>

<pallas_src>
import jax
import jax.numpy as jnp
from jax import lax
from jax.experimental import pallas as pl
from jax.experimental.pallas import tpu as pltpu

POWER_ITERATIONS = 1
EPS = 1e-12


def _round_up(a, b):
    return (a + b - 1) // b * b


def _l2normalize(v, eps=EPS):
    return v / (jnp.linalg.norm(v) + eps)


def _pick_row_tile(OH, OW, target_rows):
    """Largest divisor d of OH s.t. d*OW <= target_rows and the (d*OW) output
    block second-minor dim is (8,128)-legal (multiple of 8, or the full dim)."""
    for d in range(OH, 0, -1):
        if OH % d:
            continue
        m = d * OW
        if m <= max(target_rows, OW) and (m % 8 == 0 or d == OH):
            return d
    return OH


# --------------------------------------------------------------------------
# Kernel 1: one-shot power iteration + 1/sigma (no weight write-back).
#   w_ref  : (Cout_pad, WF_pad)   W   (PyTorch w.view(Cout, -1) column order)
#   wt_ref : (WF_pad, Cout_pad)   W^T
#   u_ref  : (1, Cout_pad)        left singular vector estimate (padded)
#   v_ref  : (1, WF_pad)          right singular vector estimate (padded)
# Both dots contract the RHS leading dim, so the MXU consumes w / wt directly.
# --------------------------------------------------------------------------
def _power_iter_kernel(w_ref, wt_ref, u_ref, v_ref,
                       u_out_ref, v_out_ref, inv_sigma_ref):
    w = w_ref[...]
    wt = wt_ref[...]
    u = u_ref[...]
    v = v_ref[...]

    for _ in range(POWER_ITERATIONS):
        vt = jnp.dot(u, w, preferred_element_type=jnp.float32)     # (1, WF_pad) == (W^T u)^T
        v = vt / (jnp.sqrt(jnp.sum(vt * vt, keepdims=True)) + EPS)
        ut = jnp.dot(v, wt, preferred_element_type=jnp.float32)    # (1, Cout_pad) == (W v)^T
        u = ut / (jnp.sqrt(jnp.sum(ut * ut, keepdims=True)) + EPS)

    wv = jnp.dot(v, wt, preferred_element_type=jnp.float32)        # (1, Cout_pad)
    sigma = jnp.sum(wv * u, keepdims=True)                         # (1, 1)
    inv_sigma_ref[...] = 1.0 / sigma
    u_out_ref[...] = u
    v_out_ref[...] = v


def spectral_norm_conv2d(x, w_bar, u, v, bias, *, padding=1,
                         target_rows=1024, stream_dtype=jnp.bfloat16):
    """Forward of SpectralNorm(nn.Conv2d(Cin, Cout, K, stride=1, padding)).

    Returns (out_NCHW, u_new, v_new): u/v are the updated power-iteration
    buffers (PyTorch mutates them in place; here they are extra outputs).
    """
    N, Cin, H, W = x.shape
    Cout, Cin_w, KH, KW = w_bar.shape
    assert Cin == Cin_w
    OH = H + 2 * padding - KH + 1
    OW = W + 2 * padding - KW + 1
    Hp = H + 2 * padding
    Wp = W + 2 * padding
    WF = Cin * KH * KW

    WF_pad = _round_up(WF, 128)
    Cout_pad = _round_up(Cout, 128)
    tile_rows = _pick_row_tile(OH, OW, target_rows)
    M_TILE = tile_rows * OW
    n_row_tiles = OH // tile_rows

    f32 = jnp.float32

    # ---- kernel 1 operands (tiny, f32, built once wrapper-side) ----
    w2d = w_bar.reshape(Cout, WF).astype(f32)          # (c,ki,kj)-major = PyTorch order
    w_pad = jnp.zeros((Cout_pad, WF_pad), f32).at[:Cout, :WF].set(w2d)
    wt_pad = jnp.zeros((WF_pad, Cout_pad), f32).at[:WF, :Cout].set(w2d.T)
    u2 = jnp.zeros((1, Cout_pad), f32).at[0, :Cout].set(u.reshape(-1).astype(f32))
    v2 = jnp.zeros((1, WF_pad), f32).at[0, :WF].set(v.reshape(-1).astype(f32))

    u_new, v_new, inv_sigma = pl.pallas_call(
        _power_iter_kernel,
        out_shape=(jax.ShapeDtypeStruct((1, Cout_pad), f32),
                   jax.ShapeDtypeStruct((1, WF_pad), f32),
                   jax.ShapeDtypeStruct((1, 1), f32)),
    )(w_pad, wt_pad, u2, v2)

    # ---- kernel 2 operands ----
    # Conv weight in (ki,kj,c)-major column order (matches in-kernel patch
    # layout), transposed to (WF_pad, Cout_pad), streamed bf16.
    w_hwio = jnp.transpose(w_bar, (2, 3, 1, 0)).reshape(WF, Cout)
    wt_conv = (jnp.zeros((WF_pad, Cout_pad), stream_dtype)
               .at[:WF, :Cout].set(w_hwio.astype(stream_dtype)))
    b2 = jnp.zeros((1, Cout_pad), f32).at[0, :Cout].set(bias.reshape(-1).astype(f32))

    # Padded input, NHWC with (h,w) flattened so every tap slab is a 2-D,
    # contiguous pl.ds slice.  Streamed from HBM once per image, as bf16.
    xp = jnp.pad(x.astype(f32),
                 ((0, 0), (0, 0), (padding, padding), (padding, padding)))
    x_flat = (jnp.transpose(xp, (0, 2, 3, 1))
              .reshape(N, Hp * Wp, Cin).astype(stream_dtype))

    # ---- kernel 2: in-VMEM im2col + lane-dense conv matmul, 1/sigma fused ----
    def _conv_kernel(x_ref, w_ref, b_ref, inv_ref, o_ref, xf_ref, patch_ref):
        t = pl.program_id(1)

        # Once per image (t axis is sequential per core): up-convert the
        # resident bf16 image to f32 scratch and zero the patch scratch so
        # its zero-padded WF..WF_pad columns stay clean.
        @pl.when(t == 0)
        def _():
            xf_ref[...] = x_ref[...].astype(jnp.float32)
            patch_ref[...] = jnp.zeros_like(patch_ref)

        # Build the (tile_rows*OW, WF) im2col tile in VMEM from shifted slabs.
        def build_row(r, carry):
            oh = t * tile_rows + r
            row0 = r * OW
            if OW % 8 == 0:
                row0 = pl.multiple_of(row0, 8)
            for ki in range(KH):
                src = (oh + ki) * Wp
                for kj in range(KW):
                    col0 = (ki * KW + kj) * Cin
                    patch_ref[pl.ds(row0, OW), pl.ds(col0, Cin)] = (
                        xf_ref[pl.ds(src + kj, OW), :])
            return carry

        lax.fori_loop(0, tile_rows, build_row, 0)

        acc = jnp.dot(patch_ref[...].astype(stream_dtype), w_ref[...],
                      preferred_element_type=jnp.float32)
        o_ref[...] = (acc * inv_ref[...] + b_ref[...]).astype(o_ref.dtype)

    x_bytes = x_flat.size * x_flat.dtype.itemsize
    w_bytes = wt_conv.size * wt_conv.dtype.itemsize
    o_bytes = N * OH * OW * Cout_pad * 4

    out_flat = pl.pallas_call(
        _conv_kernel,
        out_shape=jax.ShapeDtypeStruct((N, OH * OW, Cout_pad), f32),
        grid=(N, n_row_tiles),
        in_specs=[
            pl.BlockSpec((None, Hp * Wp, Cin), lambda n, t: (n, 0, 0)),  # image (resident per n)
            pl.BlockSpec((WF_pad, Cout_pad), lambda n, t: (0, 0)),       # weight (resident)
            pl.BlockSpec((1, Cout_pad), lambda n, t: (0, 0)),            # bias (resident)
            pl.BlockSpec((1, 1), lambda n, t: (0, 0)),                   # 1/sigma (resident)
        ],
        out_specs=pl.BlockSpec((None, M_TILE, Cout_pad), lambda n, t: (n, t, 0)),
        scratch_shapes=[
            pltpu.VMEM((Hp * Wp, Cin), jnp.float32),     # f32 copy of the image
            pltpu.VMEM((M_TILE, WF_pad), jnp.float32),   # im2col patch tile
        ],
        compiler_params=pltpu.CompilerParams(
            # t must stay sequential per core: image/patch init is gated on t==0.
            dimension_semantics=("parallel", "arbitrary"),
            vmem_limit_bytes=48 * 1024 * 1024,   # safe on v5e/v6e (128 MiB) and v7x (64 MiB)
        ),
        cost_estimate=pl.CostEstimate(
            flops=2 * N * OH * OW * WF_pad * Cout_pad,
            bytes_accessed=x_bytes + w_bytes + o_bytes,
            transcendentals=0,
        ),
    )(x_flat, wt_conv, b2, inv_sigma)

    out = (out_flat[:, :, :Cout]
           .reshape(N, OH, OW, Cout)
           .transpose(0, 3, 1, 2))
    return out, u_new[0, :Cout], v_new[0, :WF]


def _reference(x, w_bar, u, v, bias, padding=1):
    """Pure-JAX reference reproducing SpectralNorm._update_u_v + Conv2d."""
    hi = lax.Precision.HIGHEST
    Cout = w_bar.shape[0]
    w2d = w_bar.reshape(Cout, -1)
    for _ in range(POWER_ITERATIONS):
        v = _l2normalize(jnp.dot(w2d.T, u, precision=hi))
        u = _l2normalize(jnp.dot(w2d, v, precision=hi))
    sigma = jnp.dot(u, jnp.dot(w2d, v, precision=hi), precision=hi)
    w_n = w_bar / sigma
    out = lax.conv_general_dilated(
        x, w_n, window_strides=(1, 1),
        padding=((padding, padding), (padding, padding)),
        dimension_numbers=("NCHW", "OIHW", "NCHW"),
        precision=hi)
    return out + bias[None, :, None, None], u, v


if __name__ == "__main__":
    key = jax.random.PRNGKey(0)
    k_w, k_u, k_v, k_b, k_x = jax.random.split(key, 5)

    N, Cin, H, W = 2, 4, 16, 16
    Cout, K = 8, 3
    WF = Cin * K * K

    # Deterministic parameter init (as in SpectralNorm._make_params).
    w_bar = jax.random.normal(k_w, (Cout, Cin, K, K), jnp.float32) * 0.1
    u0 = _l2normalize(jax.random.normal(k_u, (Cout,), jnp.float32))
    v0 = _l2normalize(jax.random.normal(k_v, (WF,), jnp.float32))
    bias = jax.random.normal(k_b, (Cout,), jnp.float32) * 0.05
    x = jax.random.normal(k_x, (N, Cin, H, W), jnp.float32)

    out, u_new, v_new = spectral_norm_conv2d(x, w_bar, u0, v0, bias, padding=1)
    out = jax.block_until_ready(out)

    ref_out, ref_u, ref_v = _reference(x, w_bar, u0, v0, bias, padding=1)
    assert out.shape == (N, Cout, H, W)
    max_err = float(jnp.max(jnp.abs(out - ref_out)))
    # Conv operands stream as bf16 (f32 accumulation) -> relaxed tolerance;
    # u / v / sigma stay on the f32 path.
    assert jnp.allclose(out, ref_out, atol=3e-2, rtol=3e-2), \
        f"max abs err = {max_err}"
    assert jnp.allclose(u_new, ref_u, atol=2e-3, rtol=2e-3)
    assert jnp.allclose(v_new, ref_v, atol=2e-3, rtol=2e-3)

    print("KERNEL_OK")
</pallas_src>

<mosaic_0001>
module attributes {stable_mosaic.version = 11 : i64} {
  func.func @_power_iter_kernel(%arg0: memref<128x128xf32, #tpu.memory_space<vmem>>, %arg1: memref<128x128xf32, #tpu.memory_space<vmem>>, %arg2: memref<1x128xf32, #tpu.memory_space<vmem>>, %arg3: memref<1x128xf32, #tpu.memory_space<vmem>>, %arg4: memref<1x128xf32, #tpu.memory_space<vmem>>, %arg5: memref<1x128xf32, #tpu.memory_space<vmem>>, %arg6: memref<1x1xf32, #tpu.memory_space<vmem>>) attributes {dimension_semantics = [], scalar_prefetch = 0 : i64, scratch_operands = 0 : i64, tpu.core_type = #tpu.core_type<tc>} {
    %c0 = arith.constant 0 : index
    %c0_0 = arith.constant 0 : index
    %0 = vector.load %arg0[%c0, %c0_0] : memref<128x128xf32, #tpu.memory_space<vmem>>, vector<128x128xf32>
    %c0_1 = arith.constant 0 : index
    %c0_2 = arith.constant 0 : index
    %1 = vector.load %arg1[%c0_1, %c0_2] : memref<128x128xf32, #tpu.memory_space<vmem>>, vector<128x128xf32>
    %c0_3 = arith.constant 0 : index
    %c0_4 = arith.constant 0 : index
    %2 = vector.load %arg2[%c0_3, %c0_4] : memref<1x128xf32, #tpu.memory_space<vmem>>, vector<1x128xf32>
    %cst = arith.constant dense<0.000000e+00> : vector<1x128xf32>
    %3 = tpu.matmul %2, %0, %cst {dimension_numbers = #tpu.dot_dimension_numbers<[1], [0], [0], [1], [0, 0, 1, 1], [], []>} : vector<1x128xf32>, vector<128x128xf32>, vector<1x128xf32> -> vector<1x128xf32>
    %4 = arith.mulf %3, %3 : vector<1x128xf32>
    %5 = vector.shape_cast %4 : vector<1x128xf32> to vector<1x1x128xf32>
    %cst_5 = arith.constant dense<0.000000e+00> : vector<1xf32>
    %6 = vector.multi_reduction <add>, %5, %cst_5 [1, 2] : vector<1x1x128xf32> to vector<1xf32>
    %7 = vector.shape_cast %6 : vector<1xf32> to vector<1x1x1xf32>
    %8 = vector.extract %7[0, 0, 0] : f32 from vector<1x1x1xf32>
    %9 = vector.broadcast %8 : f32 to vector<1x1xf32>
    %10 = math.sqrt %9 : vector<1x1xf32>
    %cst_6 = arith.constant 9.99999996E-13 : f32
    %11 = vector.broadcast %cst_6 : f32 to vector<1x1xf32>
    %12 = arith.addf %10, %11 : vector<1x1xf32>
    %13 = vector.broadcast %12 : vector<1x1xf32> to vector<1x128xf32>
    %14 = arith.divf %3, %13 : vector<1x128xf32>
    %cst_7 = arith.constant dense<0.000000e+00> : vector<1x128xf32>
    %15 = tpu.matmul %14, %1, %cst_7 {dimension_numbers = #tpu.dot_dimension_numbers<[1], [0], [0], [1], [0, 0, 1, 1], [], []>} : vector<1x128xf32>, vector<128x128xf32>, vector<1x128xf32> -> vector<1x128xf32>
    %16 = arith.mulf %15, %15 : vector<1x128xf32>
    %17 = vector.shape_cast %16 : vector<1x128xf32> to vector<1x1x128xf32>
    %cst_8 = arith.constant dense<0.000000e+00> : vector<1xf32>
    %18 = vector.multi_reduction <add>, %17, %cst_8 [1, 2] : vector<1x1x128xf32> to vector<1xf32>
    %19 = vector.shape_cast %18 : vector<1xf32> to vector<1x1x1xf32>
    %20 = vector.extract %19[0, 0, 0] : f32 from vector<1x1x1xf32>
    %21 = vector.broadcast %20 : f32 to vector<1x1xf32>
    %22 = math.sqrt %21 : vector<1x1xf32>
    %cst_9 = arith.constant 9.99999996E-13 : f32
    %23 = vector.broadcast %cst_9 : f32 to vector<1x1xf32>
    %24 = arith.addf %22, %23 : vector<1x1xf32>
    %25 = vector.broadcast %24 : vector<1x1xf32> to vector<1x128xf32>
    %26 = arith.divf %15, %25 : vector<1x128xf32>
    %cst_10 = arith.constant dense<0.000000e+00> : vector<1x128xf32>
    %27 = tpu.matmul %14, %1, %cst_10 {dimension_numbers = #tpu.dot_dimension_numbers<[1], [0], [0], [1], [0, 0, 1, 1], [], []>} : vector<1x128xf32>, vector<128x128xf32>, vector<1x128xf32> -> vector<1x128xf32>
    %28 = arith.mulf %27, %26 : vector<1x128xf32>
    %29 = vector.shape_cast %28 : vector<1x128xf32> to vector<1x1x128xf32>
    %cst_11 = arith.constant dense<0.000000e+00> : vector<1xf32>
    %30 = vector.multi_reduction <add>, %29, %cst_11 [1, 2] : vector<1x1x128xf32> to vector<1xf32>
    %31 = vector.shape_cast %30 : vector<1xf32> to vector<1x1x1xf32>
    %32 = vector.extract %31[0, 0, 0] : f32 from vector<1x1x1xf32>
    %33 = vector.broadcast %32 : f32 to vector<1x1xf32>
    %cst_12 = arith.constant 1.000000e+00 : f32
    %34 = vector.broadcast %cst_12 : f32 to vector<1x1xf32>
    %35 = arith.divf %34, %33 : vector<1x1xf32>
    %c0_13 = arith.constant 0 : index
    %c0_14 = arith.constant 0 : index
    %36 = vector.load %arg6[%c0_13, %c0_14] : memref<1x1xf32, #tpu.memory_space<vmem>>, vector<1x1xf32>
    tpu.vector_store %arg6[%c0_13, %c0_14], %35 {strides = array<i32>} : memref<1x1xf32, #tpu.memory_space<vmem>>, vector<1x1xf32>,
    %c0_15 = arith.constant 0 : index
    %c0_16 = arith.constant 0 : index
    %37 = vector.load %arg4[%c0_15, %c0_16] : memref<1x128xf32, #tpu.memory_space<vmem>>, vector<1x128xf32>
    tpu.vector_store %arg4[%c0_15, %c0_16], %26 {strides = array<i32>} : memref<1x128xf32, #tpu.memory_space<vmem>>, vector<1x128xf32>,
    %c0_17 = arith.constant 0 : index
    %c0_18 = arith.constant 0 : index
    %38 = vector.load %arg5[%c0_17, %c0_18] : memref<1x128xf32, #tpu.memory_space<vmem>>, vector<1x128xf32>
    tpu.vector_store %arg5[%c0_17, %c0_18], %14 {strides = array<i32>} : memref<1x128xf32, #tpu.memory_space<vmem>>, vector<1x128xf32>,
    return
  }
}

</mosaic_0001>

<bundles_post_ra>
// kernel: tpu_custom_call.1
= control target key start
LH: loop header
LB: loop body
LE: loop exit
PB: predicated region body
PF: predicated region fallthrough
CT: control target
= control target key end

     0   :  { %12 = vsyncpa [#allocation3], 0  ;;  %s757_s0 = inlined_call_operand.hbm [shape: f32[128,128], index: 0, kind: input, shape index: {}]   ;;  %s758_s1 = inlined_call_operand.hbm [shape: f32[128,128], index: 1, kind: input, shape index: {}]   ;;  %s759_s2 = inlined_call_operand.vmem [shape: f32[1,128], index: 2, kind: input, shape index: {}]   ;;  %s760_s3 = inlined_call_operand.vmem [shape: f32[1,128], index: 3, kind: input, shape index: {}]   ;;  %s761_s4 = inlined_call_operand.hbm [shape: f32[1,128], index: 4, kind: output, shape index: {0}]   ;;  %s762_s5 = inlined_call_operand.hbm [shape: f32[1,128], index: 5, kind: output, shape index: {1}]   ;;  %s763_s6 = inlined_call_operand.hbm [shape: f32[1,1], index: 6, kind: output, shape index: {2}]  }
   0x1   :  { %13 = vsyncpa [#allocation6], 0 }
   0x2   :  { %14 = vsyncpa [#allocation4], 0 }
   0x3   :  { %15 = vsyncpa [#allocation9], 0  ;;  %s625_s21 = smov [#allocation2]   ;;  %s507_s3 = scalar_lea.hbm %s757_s0, 2048 }
   0x4   :  { %s21_s22 = sshll.u32 %s625_s21, 4  ;;  %p508_p0 = scmp.ne.s32.totalorder %s757_s0, %s507_s3  ;;  %s22_s22 = int_to_ptr.vmem [resolvable:$true] %s21_s22 }
   0x5   :  { %p511_p1 = scmp.lt.u32.totalorder %s507_s3, %s757_s0 }
   0x7   :  { %p513_p2 = pnand %p511_p1, %p508_p0 }
   0x9   :  { %516 = shalt.err (!%p513_p2)
}
   0xa   :  { %s517_s29 = scalar_lea.vmem %s22_s22, 2048  ;;  %p522_p4 = scmp.lt.s32.totalorder %s22_s22, %s22_s22 }
   0xb   :  { %p518_p3 = scmp.ne.s32.totalorder %s22_s22, %s517_s29  ;;  %p523_p5 = scmp.lt.s32.totalorder %s517_s29, %s517_s29 }
   0xd   :  { %p524_p6 = por %p523_p5, %p522_p4 }
   0xf   :  { %p525_p7 = pnand %p524_p6, %p518_p3 }
  0x11   :  { %528 = shalt.err (!%p525_p7)
}
  0x12   :  { %s626_s30 = smov 128   ;;  %s627_s7 = smov 8  }
  0x13   :  { %27 = dma.hbm_to_vmem [thread:$0]  %s757_s0, 2048, %s22_s22, [#allocation3], %s626_s30, %s626_s30, %s627_s7  }
  0x14   :  { %s628_s10 = smov [#allocation5]   ;;  %s529_s14 = scalar_lea.hbm %s758_s1, 2048 }
  0x15   :  { %s33_s11 = sshll.u32 %s628_s10, 4  ;;  %p530_p8 = scmp.ne.s32.totalorder %s758_s1, %s529_s14  ;;  %s34_s11 = int_to_ptr.vmem [resolvable:$true] %s33_s11 }
  0x16   :  { %p533_p9 = scmp.lt.u32.totalorder %s529_s14, %s758_s1 }
  0x18   :  { %p535_p10 = pnand %p533_p9, %p530_p8 }
  0x1a   :  { %538 = shalt.err (!%p535_p10)
}
  0x1b   :  { %s539_s19 = scalar_lea.vmem %s34_s11, 2048  ;;  %p544_p12 = scmp.lt.s32.totalorder %s34_s11, %s34_s11 }
  0x1c   :  { %p540_p11 = scmp.ne.s32.totalorder %s34_s11, %s539_s19  ;;  %p545_p13 = scmp.lt.s32.totalorder %s539_s19, %s539_s19 }
  0x1e   :  { %p546_p0 = por %p545_p13, %p544_p12 }
  0x20   :  { %p547_p1 = pnand %p546_p0, %p540_p11 }
  0x22   :  { %550 = shalt.err (!%p547_p1)
}
  0x23   :  { %39 = dma.hbm_to_vmem [thread:$0]  %s758_s1, 2048, %s34_s11, [#allocation6], %s626_s30, %s626_s30, %s627_s7  }
  0x24   :  { %617 = dma.done.wait [#allocation3], 2048  }
  0x25   :  { %618 = vsyncadd [#allocation3], 4294965248 }
  0x26   :  { %619 = dma.done.wait [#allocation6], 2048  }
  0x27   :  { %620 = vsyncadd [#allocation6], 4294965248  ;;  %v629_v0 = vmov 0.0|0.0   ;;  %vm630_vm0 = vmmov 0   ;;  %v631_v1 = vmov 0.0   ;;  %v50_v2 = vld [vmem:[#allocation2] sm:$0xff] }
  0x28   :  { %433 = vmatprep.subr.bf16.mxu0 %v629_v0  ;;  %395 = vmatprep.mubr.msk.f32.mxu0 %vm630_vm0, %v631_v1  ;;  %v51_v3 = vld [vmem:[#allocation2 + $0x8] sm:$0xff]  ;;  %v52_v4 = vld [vmem:[#allocation2 + $0x10] sm:$0xff]  ;;  %v53_v6 = vld [vmem:[#allocation2 + $0x18] sm:$0xff]  ;;  %vm154_vm1 = vcmask 1040384   ;;  %s632_s23 = smov [#allocation8]   ;;  %s633_s3 = smov [#allocation7]  }
  0x29   :  { %457 = vmatprep.subr.bf16.mxu1 %v629_v0  ;;  %430 = vmatprep.mubr.msk.f32.mxu1 %vm630_vm0, %v631_v1  ;;  %v434_v5 = vpack.c.bf16 %v51_v3, %v50_v2  ;;  %v437_v7 = vpack.c.bf16 %v53_v6, %v52_v4  ;;  %v54_v8 = vld [vmem:[#allocation2 + $0x20] sm:$0xff]  ;;  %v55_v9 = vld [vmem:[#allocation2 + $0x28] sm:$0xff]  ;;  %v56_v11 = vld [vmem:[#allocation2 + $0x30] sm:$0xff]  ;;  %s302_s24 = sshll.u32 %s632_s23, 4  ;;  %s292_s25 = sshll.u32 %s633_s3, 4  ;;  %s303_s24 = int_to_ptr.vmem [resolvable:$true] %s302_s24  ;;  %s293_s25 = int_to_ptr.vmem [resolvable:$true] %s292_s25 }
  0x2a   :  { %v440_v10 = vpack.c.bf16 %v55_v9, %v54_v8  ;;  %v57_v12 = vld [vmem:[#allocation2 + $0x38] sm:$0xff]  ;;  %v58_v14 = vld [vmem:[#allocation2 + $0x40] sm:$0xff]  ;;  %v59_v15 = vld [vmem:[#allocation2 + $0x48] sm:$0xff]  ;;  %s551_s26 = scalar_lea.vmem %s303_s24, 16  ;;  %s555_s27 = scalar_lea.vmem %s303_s24, 32 }
  0x2b   :  { %435 = vmatpush3.bf16.msra.mxu0 %v434_v5  ;;  %v443_v13 = vpack.c.bf16 %v57_v12, %v56_v11  ;;  %v446_v16 = vpack.c.bf16 %v59_v15, %v58_v14  ;;  %v60_v17 = vld [vmem:[#allocation2 + $0x50] sm:$0xff]  ;;  %v61_v18 = vld [vmem:[#allocation2 + $0x58] sm:$0xff]  ;;  %v62_v20 = vld [vmem:[#allocation2 + $0x60] sm:$0xff]  ;;  %p552_p2 = scmp.ne.s32.totalorder %s303_s24, %s551_s26  ;;  %p556_p3 = scmp.lt.s32.totalorder %s303_s24, %s303_s24 }
  0x2c   :  { %436 = vmatprep.subr.bf16.mxu0 %v629_v0  ;;  %v449_v19 = vpack.c.bf16 %v61_v18, %v60_v17  ;;  %v63_v21 = vld [vmem:[#allocation2 + $0x68] sm:$0xff]  ;;  %v64_v23 = vld [vmem:[#allocation2 + $0x70] sm:$0xff]  ;;  %v65_v24 = vld [vmem:[#allocation2 + $0x78] sm:$0xff]  ;;  %p557_p4 = scmp.lt.s32.totalorder %s555_s27, %s551_s26 }
  0x2d   :  { %v452_v22 = vpack.c.bf16 %v63_v21, %v62_v20  ;;  %v455_v25 = vpack.c.bf16 %v65_v24, %v64_v23  ;;  %v82_v26 = vld [vmem:[%s759_s2] sm:$0x1]  ;;  %v67_v32 = vld [vmem:[#allocation5 + $0x8] sm:$0xff]  ;;  %v68_v34 = vld [vmem:[#allocation5 + $0x10] sm:$0xff] }
  0x2e   :  { %v66_v31 = vld [vmem:[#allocation5] sm:$0xff]  ;;  %v69_v35 = vld [vmem:[#allocation5 + $0x18] sm:$0xff]  ;;  %v71_v38 = vld [vmem:[#allocation5 + $0x28] sm:$0xff]  ;;  %p558_p5 = por %p557_p4, %p556_p3 }
  0x2f   :  { %438 = vmatpush3.bf16.msra.mxu0 %v437_v7  ;;  %v458_v33 = vpack.c.bf16 %v67_v32, %v66_v31  ;;  %v461_v36 = vpack.c.bf16 %v69_v35, %v68_v34  ;;  %v70_v37 = vld [vmem:[#allocation5 + $0x20] sm:$0xff]  ;;  %v72_v40 = vld [vmem:[#allocation5 + $0x30] sm:$0xff]  ;;  %v73_v41 = vld [vmem:[#allocation5 + $0x38] sm:$0xff] }
  0x30   :  { %439 = vmatprep.subr.bf16.mxu0 %v629_v0  ;;  %v464_v39 = vpack.c.bf16 %v71_v38, %v70_v37  ;;  %v467_v42 = vpack.c.bf16 %v73_v41, %v72_v40  ;;  %v74_v43 = vld [vmem:[#allocation5 + $0x40] sm:$0xff]  ;;  %v75_v44 = vld [vmem:[#allocation5 + $0x48] sm:$0xff]  ;;  %v76_v46 = vld [vmem:[#allocation5 + $0x50] sm:$0xff]  ;;  %p559_p6 = pnand %p558_p5, %p552_p2 }
  0x31   :  { %459 = vmatpush3.bf16.msra.mxu1 %v458_v33  ;;  %v470_v45 = vpack.c.bf16 %v75_v44, %v74_v43  ;;  %v77_v47 = vld [vmem:[#allocation5 + $0x58] sm:$0xff]  ;;  %v78_v49 = vld [vmem:[#allocation5 + $0x60] sm:$0xff]  ;;  %v79_v50 = vld [vmem:[#allocation5 + $0x68] sm:$0xff] }
  0x32   :  { %460 = vmatprep.subr.bf16.mxu1 %v629_v0  ;;  %v473_v48 = vpack.c.bf16 %v77_v47, %v76_v46  ;;  %v476_v51 = vpack.c.bf16 %v79_v50, %v78_v49  ;;  %v80_v52 = vld [vmem:[#allocation5 + $0x70] sm:$0xff]  ;;  %v81_v53 = vld [vmem:[#allocation5 + $0x78] sm:$0xff] }
  0x33   :  { %441 = vmatpush3.bf16.msra.mxu0 %v440_v10  ;;  %v479_v54 = vpack.c.bf16 %v81_v53, %v80_v52 }
  0x34   :  { %442 = vmatprep.subr.bf16.mxu0 %v629_v0 }
  0x35   :  { %462 = vmatpush3.bf16.msra.mxu1 %v461_v36 }
  0x36   :  { %463 = vmatprep.subr.bf16.mxu1 %v629_v0 }
  0x37   :  { %444 = vmatpush3.bf16.msra.mxu0 %v443_v13 }
  0x38   :  { %445 = vmatprep.subr.bf16.mxu0 %v629_v0 }
  0x39   :  { %465 = vmatpush3.bf16.msra.mxu1 %v464_v39 }
  0x3a   :  { %466 = vmatprep.subr.bf16.mxu1 %v629_v0 }
  0x3b   :  { %447 = vmatpush3.bf16.msra.mxu0 %v446_v16 }
  0x3c   :  { %448 = vmatprep.subr.bf16.mxu0 %v629_v0 }
  0x3d   :  { %468 = vmatpush3.bf16.msra.mxu1 %v467_v42 }
  0x3e   :  { %469 = vmatprep.subr.bf16.mxu1 %v629_v0 }
  0x3f   :  { %450 = vmatpush3.bf16.msra.mxu0 %v449_v19 }
  0x40   :  { %451 = vmatprep.subr.bf16.mxu0 %v629_v0 }
  0x41   :  { %471 = vmatpush3.bf16.msra.mxu1 %v470_v45 }
  0x42   :  { %472 = vmatprep.subr.bf16.mxu1 %v629_v0 }
  0x43   :  { %453 = vmatpush3.bf16.msra.mxu0 %v452_v22 }
  0x44   :  { %454 = vmatprep.subr.bf16.mxu0 %v629_v0 }
  0x45   :  { %474 = vmatpush3.bf16.msra.mxu1 %v473_v48 }
  0x46   :  { %475 = vmatprep.subr.bf16.mxu1 %v629_v0 }
  0x47   :  { %456 = vmatpush3.bf16.msra.mxu0 %v455_v25 }
  0x49   :  { %477 = vmatpush3.bf16.msra.mxu1 %v476_v51 }
  0x4a   :  { %396 = vmatmul.mubr.f32.vlgmr.msra.gmra.mrb[0].mxu0 %v82_v26  ;;  %478 = vmatprep.subr.bf16.mxu1 %v629_v0 }
  0x4d   :  { %480 = vmatpush3.bf16.msra.mxu1 %v479_v54 }
 0x11d   :  { %v706_v27 = vpop.f32.mrb[0].mxu0 }
 0x11e   :  { %v397_v28 = vpop.f32.mrb[1].mxu0  ;;  %v153_v29 = vmul.f32 %v706_v27, %v706_v27 }
 0x120   :  { %v155_v30 = vsel %vm154_vm1, %v153_v29, 0.0 }
 0x121   :  { %156 = vadd.xlane.f32.xlu0 %v155_v30 }
 0x1ae   :  { %v157_v55 = vpop.xlane.xlu0 %156 }
 0x1af   :  { %v158_v56 = vrot.slane %v157_v55, 4 }
 0x1b1   :  { %v159_v57 = vadd.f32 %v158_v56, %v157_v55 }
 0x1b3   :  { %v160_v58 = vrot.slane %v159_v57, 2 }
 0x1b5   :  { %v161_v59 = vadd.f32 %v160_v58, %v159_v57 }
 0x1b7   :  { %v162_v60 = vrot.slane %v161_v59, 1 }
 0x1b9   :  { %v163_v61 = vadd.f32 %v162_v60, %v161_v59 }
 0x1bb   :  { %481 = vpush %v163_v61 }
 0x1ec   :  { %s482_s2 = spop %481 }
 0x1ed   :  { %v165_v62 = vstv %s482_s2 }
 0x1ee   :  { %497 = vrsqrt.f32 %v165_v62  ;;  %vm168_vm2 = vcmp.eq.f32.partialorder %v165_v62, inf  ;;  %v171_v2 = vand.u32 2147483648, %v165_v62  ;;  %vm170_vm3 = vcmp.eq.f32.partialorder %v165_v62, 0.0 }
 0x1f8   :  { %v498_v63 = vpop.eup %497 }
 0x1f9   :  { %v167_v1 = vmul.f32 %v498_v63, %v165_v62 }
 0x1fb   :  { %v169_v3 = vsel %vm168_vm2, %v165_v62, %v167_v1 }
 0x1fc   :  { %v172_v4 = vsel %vm170_vm3, %v171_v2, %v169_v3 }
 0x1fd   :  { %v173_v0 = vadd.f32 1e-12, %v172_v4 }
 0x1ff   :  { %499 = vrcp.f32 %v173_v0 }
 0x209   :  { %v500_v5 = vpop.eup %499 }
 0x20a   :  { %v175_v6 = vmul.f32 %v500_v5, %v706_v27 }
 0x20c   :  { %431 = vmatmul.mubr.f32.vlgmr.msra.gmra.mrb[0].mxu1 %v175_v6  ;;  %285 = vst [vmem:[#allocation8] sm:$0x1] %v175_v6 }
 0x2df   :  { %v242_v7 = vpop.f32.mrb[0].mxu1 }
 0x2e0   :  { %v432_v8 = vpop.f32.mrb[1].mxu1  ;;  %v246_v9 = vmul.f32 %v242_v7, %v242_v7 }
 0x2e2   :  { %v247_v10 = vsel %vm154_vm1, %v246_v9, 0.0 }
 0x2e3   :  { %248 = vadd.xlane.f32.xlu0 %v247_v10 }
 0x370   :  { %v249_v11 = vpop.xlane.xlu0 %248 }
 0x371   :  { %v250_v12 = vrot.slane %v249_v11, 4 }
 0x373   :  { %v251_v13 = vadd.f32 %v250_v12, %v249_v11 }
 0x375   :  { %v252_v14 = vrot.slane %v251_v13, 2 }
 0x377   :  { %v253_v15 = vadd.f32 %v252_v14, %v251_v13 }
 0x379   :  { %v254_v16 = vrot.slane %v253_v15, 1 }
 0x37b   :  { %v255_v17 = vadd.f32 %v254_v16, %v253_v15 }
 0x37d   :  { %483 = vpush %v255_v17 }
 0x3ae   :  { %s484_s22 = spop %483 }
 0x3af   :  { %v257_v18 = vstv %s484_s22 }
 0x3b0   :  { %501 = vrsqrt.f32 %v257_v18  ;;  %vm260_vm4 = vcmp.eq.f32.partialorder %v257_v18, inf  ;;  %v263_v21 = vand.u32 2147483648, %v257_v18  ;;  %vm262_vm5 = vcmp.eq.f32.partialorder %v257_v18, 0.0 }
 0x3ba   :  { %v502_v19 = vpop.eup %501 }
 0x3bb   :  { %v259_v20 = vmul.f32 %v502_v19, %v257_v18 }
 0x3bd   :  { %v261_v22 = vsel %vm260_vm4, %v257_v18, %v259_v20 }
 0x3be   :  { %v264_v23 = vsel %vm262_vm5, %v263_v21, %v261_v22 }
 0x3bf   :  { %v265_v24 = vadd.f32 1e-12, %v264_v23 }
 0x3c1   :  { %503 = vrcp.f32 %v265_v24 }
 0x3cb   :  { %v504_v25 = vpop.eup %503 }
 0x3cc   :  { %v267_v26 = vmul.f32 %v504_v25, %v242_v7 }
 0x3ce   :  { %v268_v27 = vmul.f32 %v267_v26, %v242_v7  ;;  %284 = vst [vmem:[#allocation7] sm:$0x1] %v267_v26 }
 0x3d0   :  { %v269_v28 = vsel %vm154_vm1, %v268_v27, 0.0 }
 0x3d1   :  { %270 = vadd.xlane.f32.xlu1 %v269_v28 }
 0x3d2   :  { %562 = shalt.err (!%p559_p6)
}
 0x3d3   :  { %s563_s30 = scalar_lea.hbm %s762_s5, 16 }
 0x3d4   :  { %p564_p7 = scmp.ne.s32.totalorder %s762_s5, %s563_s30  ;;  %p567_p8 = scmp.lt.u32.totalorder %s563_s30, %s762_s5 }
 0x3d6   :  { %p569_p9 = pnand %p567_p8, %p564_p7 }
 0x3d8   :  { %572 = shalt.err (!%p569_p9)
}
 0x3d9   :  { %305 = dma.vmem_to_hbm [thread:$0]  %s303_s24, 16, %s762_s5, [#allocation9]  }
 0x3da   :  { %s573_s13 = scalar_lea.vmem %s293_s25, 16  ;;  %s577_s14 = scalar_lea.vmem %s293_s25, 32 }
 0x3db   :  { %p574_p10 = scmp.ne.s32.totalorder %s293_s25, %s573_s13  ;;  %p578_p11 = scmp.lt.s32.totalorder %s293_s25, %s293_s25 }
 0x3dc   :  { %p579_p12 = scmp.lt.s32.totalorder %s577_s14, %s573_s13 }
 0x3de   :  { %p580_p13 = por %p579_p12, %p578_p11 }
 0x3e0   :  { %p581_p0 = pnand %p580_p13, %p574_p10 }
 0x3e2   :  { %584 = shalt.err (!%p581_p0)
}
 0x3e3   :  { %s585_s17 = scalar_lea.hbm %s761_s4, 16 }
 0x3e4   :  { %p586_p1 = scmp.ne.s32.totalorder %s761_s4, %s585_s17  ;;  %p589_p2 = scmp.lt.u32.totalorder %s585_s17, %s761_s4 }
 0x3e6   :  { %p591_p3 = pnand %p589_p2, %p586_p1 }
 0x3e8   :  { %594 = shalt.err (!%p591_p3)
}
 0x3e9   :  { %295 = dma.vmem_to_hbm [thread:$0]  %s293_s25, 16, %s761_s4, [#allocation4]   ;;  %vm282_vm6 = vcmask 0  }
 0x3ea   :  { %s634_s2 = smov [#allocation10]  }
 0x3eb   :  { %s312_s22 = sshll.u32 %s634_s2, 4  ;;  %s313_s22 = int_to_ptr.vmem [resolvable:$true] %s312_s22 }
 0x3ec   :  { %s595_s23 = scalar_lea.vmem %s313_s22, 16  ;;  %s599_s4 = scalar_lea.vmem %s313_s22, 32 }
 0x3ed   :  { %p596_p4 = scmp.ne.s32.totalorder %s313_s22, %s595_s23  ;;  %p600_p5 = scmp.lt.s32.totalorder %s313_s22, %s313_s22 }
 0x3ee   :  { %p601_p6 = scmp.lt.s32.totalorder %s599_s4, %s595_s23 }
 0x3f0   :  { %p602_p7 = por %p601_p6, %p600_p5 }
 0x3f2   :  { %p603_p8 = pnand %p602_p7, %p596_p4 }
 0x45e   :  { %v271_v29 = vpop.xlane.xlu1 %270 }
 0x45f   :  { %v272_v30 = vrot.slane %v271_v29, 4 }
 0x461   :  { %v273_v31 = vadd.f32 %v272_v30, %v271_v29 }
 0x463   :  { %v274_v32 = vrot.slane %v273_v31, 2 }
 0x465   :  { %v275_v33 = vadd.f32 %v274_v32, %v273_v31 }
 0x467   :  { %v276_v34 = vrot.slane %v275_v33, 1 }
 0x469   :  { %v277_v35 = vadd.f32 %v276_v34, %v275_v33 }
 0x46b   :  { %485 = vpush %v277_v35 }
 0x49c   :  { %s486_s21 = spop %485 }
 0x49d   :  { %v279_v36 = vstv %s486_s21 }
 0x49e   :  { %505 = vrcp.f32 %v279_v36 }
 0x4a8   :  { %v506_v37 = vpop.eup %505 }
 0x4a9   :  { %283 = vst.msk [vmem:[#allocation10] sm:$0x1] %vm282_vm6, %v506_v37 }
 0x4aa   :  { %606 = shalt.err (!%p603_p8)
}
 0x4ab   :  { %s607_s25 = scalar_lea.hbm %s763_s6, 16 }
 0x4ac   :  { %p608_p9 = scmp.ne.s32.totalorder %s763_s6, %s607_s25  ;;  %p611_p10 = scmp.lt.u32.totalorder %s607_s25, %s763_s6 }
 0x4ae   :  { %p613_p11 = pnand %p611_p10, %p608_p9 }
 0x4b0   :  { %616 = shalt.err (!%p613_p11)
}
 0x4b1   :  { %315 = dma.vmem_to_hbm [thread:$0]  %s313_s22, 16, %s763_s6, [#allocation9]  }
 0x4b2   :  { %621 = dma.done.wait [#allocation4], 16  }
 0x4b3   :  { %622 = vsyncadd [#allocation4], 4294967280 }
 0x4b4   :  { %623 = dma.done.wait [#allocation9], 32  }
 0x4b5   :  { %624 = vsyncadd [#allocation9], 4294967264 }
 0x4b6   :  { %325 = vsyncpa [#allocation3], 1 }
 0x4b7   :  { %326 = vsyncpa [#allocation6], 1 }
 0x4b8   :  { %327 = vsyncpa [#allocation4], 1 }
 0x4b9   :  { %328 = vsyncpa [#allocation9], 1 }

</bundles_post_ra>
